<compile_context>
chip_gen: v6e
topology: v6e:2x2x1
jax: 0.10.0
libtpu: 0.0.40
codegen_flags: <defaults>
</compile_context>

<pallas_src>
import functools
import math

import jax
import jax.numpy as jnp
from jax.experimental import pallas as pl
from jax.experimental.pallas import tpu as pltpu


def _pbf_kernel(x_ref, o_ref, *, freqs):
    # x_ref: VMEM f32[C, TN]   (channels on sublanes, rows on lanes)
    # o_ref: VMEM f32[2*n_freqs*C, TN]
    x = x_ref[...]
    parts = []
    # NOTE: kernel is HBM-write-bound; direct sin/cos per band is fine. If it ever becomes
    # EUP/VALU-bound (e.g. v7x + bf16 output), switch to the angle-doubling recurrence
    # (sin 2a = 2 sin a cos a, cos 2a = cos^2 a - sin^2 a) -> only 2 transcendentals/element.
    for f in freqs:
        xs = x * f                      # f = 2^k, exact in f32
        parts.append(jnp.sin(xs))
        parts.append(jnp.cos(xs))
    o_ref[...] = jnp.concatenate(parts, axis=0)   # single full-width, lane-dense store


def _pbf_kernel_masked(mask_ref, x_ref, o_ref, *, freqs):
    # mask_ref: SMEM f32[n_freqs]  (progressive band mask)
    x = x_ref[...]
    parts = []
    for k, f in enumerate(freqs):
        m = mask_ref[k]
        xs = x * f
        parts.append(jnp.sin(xs) * m)
        parts.append(jnp.cos(xs) * m)
    o_ref[...] = jnp.concatenate(parts, axis=0)


class ProgressiveBandFrequencyPallas:
    """JAX/Pallas port of the frequency-encoding variant of TCNNEncoding."""

    def __init__(self, in_channels: int, config: dict):
        self.N_freqs = int(config["n_frequencies"])
        self.in_channels = self.n_input_dims = in_channels
        self.n_output_dims = self.in_channels * (2 * self.N_freqs)
        self.n_masking_step = int(config.get("n_masking_step", 0))
        # frequency bands 2**linspace(0, N-1, N) == exact powers of two -> bake as constants
        self.freqs = tuple(float(2.0 ** k) for k in range(self.N_freqs))
        self.freq_bands = jnp.asarray(self.freqs, dtype=jnp.float32)
        self.update_step(None, None)

    def update_step(self, epoch, global_step, on_load_weights: bool = False):
        if self.n_masking_step <= 0 or global_step is None:
            self.mask = jnp.ones((self.N_freqs,), dtype=jnp.float32)
            self._mask_active = False
        else:
            ptr = (global_step / self.n_masking_step * self.N_freqs
                   - jnp.arange(self.N_freqs, dtype=jnp.float32))
            self.mask = (1.0 - jnp.cos(math.pi * jnp.clip(ptr, 0.0, 1.0))) / 2.0
            self._mask_active = True

    def __call__(self, x):
        x = jnp.asarray(x, dtype=jnp.float32)
        lead = x.shape[:-1]
        c = x.shape[-1]
        assert c == self.in_channels
        n = 1
        for d in lead:
            n *= d
        out_c = self.n_output_dims

        # ---- lane-dense layout: channels on sublanes, flattened rows on the lane axis ----
        xt = x.reshape(n, c).T                                   # (C, N)

        # Lane-axis tile: as large as fits ~24 MiB with 2x buffering of in+out (v7x-safe),
        # capped at 16K lanes, multiple of 512 (>= 128).
        bytes_per_col = 4 * (c + out_c)
        tn = (24 * 1024 * 1024) // (2 * bytes_per_col)
        tn = max(512, min(16 * 1024, (tn // 512) * 512))
        n_lane = max(128, ((n + 127) // 128) * 128)
        if n_lane <= tn:
            tn = n_lane
            n_pad = n_lane
        else:
            n_pad = ((n + tn - 1) // tn) * tn
        if n_pad != n:
            xt = jnp.pad(xt, ((0, 0), (0, n_pad - n)))           # padded cols trimmed below

        x_spec = pl.BlockSpec((c, tn), lambda i: (0, i))
        o_spec = pl.BlockSpec((out_c, tn), lambda i: (0, i))

        if self._mask_active:
            kernel = functools.partial(_pbf_kernel_masked, freqs=self.freqs)
            in_specs = [pl.BlockSpec(memory_space=pltpu.MemorySpace.SMEM), x_spec]
            args = (self.mask.astype(jnp.float32), xt)
        else:
            kernel = functools.partial(_pbf_kernel, freqs=self.freqs)
            in_specs = [x_spec]
            args = (xt,)

        # TODO(synk): optionally emit bfloat16 output (halves dominant HBM write traffic) once
        # downstream consumers' precision tolerance is confirmed.
        out_t = pl.pallas_call(
            kernel,
            out_shape=jax.ShapeDtypeStruct((out_c, n_pad), jnp.float32),
            grid_spec=pltpu.PrefetchScalarGridSpec(
                num_scalar_prefetch=0,
                grid=(n_pad // tn,),
                in_specs=in_specs,
                out_specs=o_spec,
            ),
            compiler_params=pltpu.CompilerParams(
                dimension_semantics=("parallel",),
            ),
        )(*args)

        out2 = out_t[:, :n].T                                    # (N, out_c), layout plumbing
        return out2.reshape(*lead, out_c)


def _reference(x, freqs, mask):
    outs = []
    for k, f in enumerate(freqs):
        outs.append(jnp.sin(f * x) * mask[k])
        outs.append(jnp.cos(f * x) * mask[k])
    return jnp.concatenate(outs, axis=-1)


if __name__ == "__main__":
    key = jax.random.PRNGKey(0)
    B, P, C = 2, 64, 4           # batch=2, 64 points, in_channels=4
    n_frequencies = 4
    x = jax.random.normal(key, (B, P, C), dtype=jnp.float32)

    # 1) no progressive masking (common case; mask multiply compiled out)
    enc = ProgressiveBandFrequencyPallas(C, {"n_frequencies": n_frequencies, "n_masking_step": 0})
    out = jax.block_until_ready(enc(x))
    assert out.shape == (B, P, C * 2 * n_frequencies), out.shape
    ref = _reference(x, enc.freqs, enc.mask)
    assert jnp.allclose(out, ref, atol=1e-5, rtol=1e-5), "mismatch vs reference (no mask)"

    # 2) progressive masking active (mask read from SMEM)
    enc_m = ProgressiveBandFrequencyPallas(C, {"n_frequencies": n_frequencies, "n_masking_step": 10})
    enc_m.update_step(epoch=0, global_step=5)
    out_m = jax.block_until_ready(enc_m(x))
    ref_m = _reference(x, enc_m.freqs, enc_m.mask)
    assert jnp.allclose(out_m, ref_m, atol=1e-5, rtol=1e-5), "mismatch vs reference (masked)"

    # 3) ragged row count — exercises lane padding / trimming path
    x3 = jax.random.normal(jax.random.PRNGKey(1), (2, 200, C), dtype=jnp.float32)
    out3 = jax.block_until_ready(enc(x3))
    assert out3.shape == (2, 200, C * 2 * n_frequencies), out3.shape
    ref3 = _reference(x3, enc.freqs, enc.mask)
    assert jnp.allclose(out3, ref3, atol=1e-5, rtol=1e-5), "mismatch vs reference (padded)"

    print("KERNEL_OK")
</pallas_src>

<mosaic_0001>
module attributes {stable_mosaic.version = 11 : i64} {
  func.func @_pbf_kernel(%arg0: i32, %arg1: memref<4x128xf32, #tpu.memory_space<vmem>>, %arg2: memref<32x128xf32, #tpu.memory_space<vmem>>) attributes {dimension_semantics = [#tpu.dimension_semantics<parallel>], iteration_bounds = array<i64: 1>, scalar_prefetch = 0 : i64, scratch_operands = 0 : i64, tpu.core_type = #tpu.core_type<tc>, window_params = [{transform_indices = @transform_0, window_bounds = array<i64: 4, 128>}, {transform_indices = @transform_1, window_bounds = array<i64: 32, 128>}]} {
    %c0 = arith.constant 0 : index
    %c0_0 = arith.constant 0 : index
    %0 = vector.load %arg1[%c0, %c0_0] : memref<4x128xf32, #tpu.memory_space<vmem>>, vector<4x128xf32>
    %cst = arith.constant 1.000000e+00 : f32
    %1 = vector.broadcast %cst : f32 to vector<4x128xf32>
    %2 = arith.mulf %0, %1 : vector<4x128xf32>
    %3 = math.sin %2 : vector<4x128xf32>
    %4 = math.cos %2 : vector<4x128xf32>
    %cst_1 = arith.constant 2.000000e+00 : f32
    %5 = vector.broadcast %cst_1 : f32 to vector<4x128xf32>
    %6 = arith.mulf %0, %5 : vector<4x128xf32>
    %7 = math.sin %6 : vector<4x128xf32>
    %8 = math.cos %6 : vector<4x128xf32>
    %cst_2 = arith.constant 4.000000e+00 : f32
    %9 = vector.broadcast %cst_2 : f32 to vector<4x128xf32>
    %10 = arith.mulf %0, %9 : vector<4x128xf32>
    %11 = math.sin %10 : vector<4x128xf32>
    %12 = math.cos %10 : vector<4x128xf32>
    %cst_3 = arith.constant 8.000000e+00 : f32
    %13 = vector.broadcast %cst_3 : f32 to vector<4x128xf32>
    %14 = arith.mulf %0, %13 : vector<4x128xf32>
    %15 = math.sin %14 : vector<4x128xf32>
    %16 = math.cos %14 : vector<4x128xf32>
    %17 = tpu.concatenate %3, %4, %7, %8, %11, %12, %15, %16 in 0 : vector<4x128xf32>, vector<4x128xf32>, vector<4x128xf32>, vector<4x128xf32>, vector<4x128xf32>, vector<4x128xf32>, vector<4x128xf32>, vector<4x128xf32> -> vector<32x128xf32>
    %c0_4 = arith.constant 0 : index
    %c0_5 = arith.constant 0 : index
    %18 = vector.load %arg2[%c0_4, %c0_5] : memref<32x128xf32, #tpu.memory_space<vmem>>, vector<32x128xf32>
    tpu.vector_store %arg2[%c0_4, %c0_5], %17 {strides = array<i32>} : memref<32x128xf32, #tpu.memory_space<vmem>>, vector<32x128xf32>,
    return
  }
  func.func @transform_0(%arg0: i32) -> (i32, i32) {
    %c0_i32 = arith.constant 0 : i32
    %c0_i32_0 = arith.constant 0 : i32
    return %c0_i32, %arg0 : i32, i32
  }
  func.func @transform_1(%arg0: i32) -> (i32, i32) {
    %c0_i32 = arith.constant 0 : i32
    %c0_i32_0 = arith.constant 0 : i32
    return %c0_i32, %arg0 : i32, i32
  }
}

</mosaic_0001>

<bundles_post_ra>
// kernel: tpu_custom_call.1
= control target key start
LH: loop header
LB: loop body
LE: loop exit
PB: predicated region body
PF: predicated region fallthrough
CT: control target
= control target key end

     0   :  { %6 = vsyncpa [#allocation3], 0  ;;  %s1329_s0 = inlined_call_operand.hbm [shape: f32[4,128], index: 0, kind: input, shape index: {}]   ;;  %s1330_s1 = inlined_call_operand.hbm [shape: f32[32,128], index: 1, kind: output, shape index: {}]  }
   0x1   :  { %7 = vsyncpa [#allocation4], 0  ;;  %s1009_s6 = smov [#allocation2]  }
   0x2   :  { %s14_s7 = sshll.u32 %s1009_s6, 4  ;;  %s15_s7 = int_to_ptr.vmem [resolvable:$true] %s14_s7 }
   0x3   :  { %s973_s8 = scalar_lea.vmem %s15_s7, 64  ;;  %p978_p1 = scmp.lt.s32.totalorder %s15_s7, %s15_s7 }
   0x4   :  { %p974_p0 = scmp.ne.s32.totalorder %s15_s7, %s973_s8  ;;  %p979_p2 = scmp.lt.s32.totalorder %s973_s8, %s973_s8 }
   0x6   :  { %p980_p3 = por %p979_p2, %p978_p1 }
   0x8   :  { %p981_p4 = pnand %p980_p3, %p974_p0 }
   0xa   :  { %984 = shalt.err (!%p981_p4)
}
   0xb   :  { %17 = dma.hbm_to_vmem [thread:$0]  %s1329_s0, 64, %s15_s7, [#allocation3]  }
   0xc   :  { %1005 = dma.done.wait [#allocation3], 64  }
   0xd   :  { %1006 = vsyncadd [#allocation3], 4294967232  ;;  %v1032_v0 = vld [vmem:[#allocation2] sm:$0xf]  ;;  %v1010_v26 = vmov 683565275  }
   0xe   :  { %v22_v1 = vand.u32 2147483647, %v1032_v0  ;;  %v25_v2 = vand.u32 2139095040, %v1032_v0  ;;  %v1037_v3 = vmul.f32 2.0, %v1032_v0  ;;  %v1040_v4 = vmul.f32 4.0, %v1032_v0  ;;  %s1016_s0 = smov [#allocation5]  }
   0xf   :  { %v1011_v28 = vmov 2475754826   ;;  %v1012_v30 = vmov 2131351028   ;;  %v1013_v32 = vmov 2102212464  }
  0x10   :  { %v26_v5 = vshrl.u32 %v25_v2, 23  ;;  %v29_v6 = vand.u32 8388607, %v22_v1  ;;  %v230_v7 = vand.u32 2147483647, %v1037_v3  ;;  %v233_v8 = vand.u32 2139095040, %v1037_v3 }
  0x11   :  { %v441_v12 = vand.u32 2139095040, %v1040_v4  ;;  %v1014_v34 = vmov 920167782   ;;  %v1015_v41 = vmov 1326507024   ;;  %vm24_vm13 = vcmp.lt.s32.totalorder %v1032_v0, 0 }
  0x12   :  { %v891_v9 = vadd.s32 4294967169, %v26_v5  ;;  %v234_v10 = vshrl.u32 %v233_v8, 23  ;;  %v237_v11 = vand.u32 8388607, %v230_v7  ;;  %v30_v14 = vor.u32 8388608, %v29_v6  ;;  %s879_s11 = sshll.u32 %s1016_s0, 4  ;;  %s880_s11 = int_to_ptr.vmem [resolvable:$true] %s879_s11 }
  0x13   :  { %v442_v17 = vshrl.u32 %v441_v12, 23  ;;  %vm1148_vm14 = vcmp.le.f32.partialorder %v22_v1, 0.7853982  ;;  %s985_s12 = scalar_lea.vmem %s880_s11, 512  ;;  %p990_p6 = scmp.lt.s32.totalorder %s880_s11, %s880_s11 }
  0x14   :  { %v32_v13 = vadd.s32 1, %v891_v9  ;;  %v899_v15 = vadd.s32 4294967169, %v234_v10  ;;  %v238_v16 = vor.u32 8388608, %v237_v11  ;;  %v1049_v22 = vshll.u32 %v30_v14, 8  ;;  %p986_p5 = scmp.ne.s32.totalorder %s880_s11, %s985_s12  ;;  %p991_p7 = scmp.lt.s32.totalorder %s985_s12, %s985_s12 }
  0x15   :  { %v1053_v24 = vadd.s32 4294967169, %v442_v17 }
  0x16   :  { %vm33_vm0 = vcmp.gt.s32.totalorder %v32_v13, 0  ;;  %v240_v19 = vadd.s32 1, %v899_v15  ;;  %v1051_v23 = vshll.u32 %v238_v16, 8  ;;  %p992_p8 = por %p991_p7, %p990_p6 }
  0x17   :  { %v34_v18 = vsel %vm33_vm0, %v32_v13, 0 }
  0x18   :  { %v35_v20 = vshrl.u32 %v34_v18, 5  ;;  %v36_v21 = vand.u32 31, %v34_v18  ;;  %vm241_vm1 = vcmp.gt.s32.totalorder %v240_v19, 0  ;;  %p993_p9 = pnand %p992_p8, %p986_p5 }
  0x19   :  { %v242_v46 = vsel %vm241_vm1, %v240_v19, 0 }
  0x1a   :  { %v37_v25 = vsub.s32 32, %v36_v21  ;;  %v39_v27 = vshll.u32 %v1010_v26, %v36_v21  ;;  %v42_v29 = vshll.u32 %v1011_v28, %v36_v21  ;;  %v45_v31 = vshll.u32 %v1012_v30, %v36_v21 }
  0x1b   :  { %v48_v33 = vshll.u32 %v1013_v32, %v36_v21  ;;  %v51_v35 = vshll.u32 %v1014_v34, %v36_v21  ;;  %vm54_vm2 = vcmp.lt.s32.totalorder %v35_v20, 1  ;;  %vm55_vm3 = vcmp.lt.s32.totalorder %v35_v20, 2 }
  0x1c   :  { %v38_v36 = vshrl.u32 %v1010_v26, %v37_v25  ;;  %v40_v37 = vshrl.u32 %v1011_v28, %v37_v25  ;;  %v43_v38 = vshrl.u32 %v1012_v30, %v37_v25  ;;  %v46_v39 = vshrl.u32 %v1013_v32, %v37_v25 }
  0x1d   :  { %v49_v40 = vshrl.u32 %v1014_v34, %v37_v25  ;;  %v52_v42 = vshrl.u32 %v1015_v41, %v37_v25  ;;  %vm56_vm4 = vcmp.lt.s32.totalorder %v35_v20, 3  ;;  %vm57_vm5 = vcmp.lt.s32.totalorder %v35_v20, 4 }
  0x1e   :  { %v41_v43 = vor.u32 %v40_v37, %v39_v27  ;;  %v44_v44 = vor.u32 %v43_v38, %v42_v29  ;;  %v47_v45 = vor.u32 %v46_v39, %v45_v31  ;;  %v243_v49 = vshrl.u32 %v242_v46, 5 }
  0x1f   :  { %v50_v47 = vor.u32 %v49_v40, %v48_v33  ;;  %v53_v48 = vor.u32 %v52_v42, %v51_v35  ;;  %v244_v50 = vand.u32 31, %v242_v46  ;;  %v448_v29 = vadd.s32 1, %v1053_v24 }
  0x20   :  { %v58_v51 = vsel %vm54_vm2, %v38_v36, %v41_v43  ;;  %v59_v52 = vsel %vm57_vm5, %v47_v45, 2102212464  ;;  %v62_v53 = vsel %vm54_vm2, %v41_v43, %v44_v44  ;;  %v66_v54 = vsel %vm54_vm2, %v44_v44, %v47_v45 }
  0x21   :  { %v60_v55 = vsel %vm56_vm4, %v44_v44, %v59_v52  ;;  %v63_v56 = vsel %vm57_vm5, %v50_v47, 920167782  ;;  %v67_v57 = vsel %vm57_vm5, %v53_v48, 1326507024  ;;  %v245_v58 = vsub.s32 32, %v244_v50 }
  0x22   :  { %v61_v59 = vsel %vm55_vm3, %v58_v51, %v60_v55  ;;  %v64_v60 = vsel %vm56_vm4, %v47_v45, %v63_v56  ;;  %v68_v61 = vsel %vm56_vm4, %v50_v47, %v67_v57  ;;  %v247_v62 = vshll.u32 %v1010_v26, %v244_v50 }
  0x23   :  { %v65_v63 = vsel %vm55_vm3, %v62_v53, %v64_v60  ;;  %v69_v2 = vsel %vm55_vm3, %v66_v54, %v68_v61  ;;  %v77_v5 = vmul.u32 %v1049_v22, %v61_v59  ;;  %v246_v6 = vshrl.u32 %v1010_v26, %v245_v58 }
  0x24   :  { %v1080_v8 = vmul.u32.u64.low %v1049_v22, %v69_v2  ;;  %v1081_v9 = vmul.u32.u64.high %v1049_v22, %v69_v2, %v1080_v8  ;;  %v1084_v10 = vmul.u32.u64.low %v1049_v22, %v65_v63  ;;  %v1085_v11 = vmul.u32.u64.high %v1049_v22, %v65_v63, %v1084_v10 }
  0x25   :  { %v248_v12 = vshrl.u32 %v1011_v28, %v245_v58  ;;  %v250_v13 = vshll.u32 %v1011_v28, %v244_v50  ;;  %v251_v14 = vshrl.u32 %v1012_v30, %v245_v58  ;;  %v253_v15 = vshll.u32 %v1012_v30, %v244_v50 }
  0x26   :  { %v254_v16 = vshrl.u32 %v1013_v32, %v245_v58  ;;  %v256_v17 = vshll.u32 %v1013_v32, %v244_v50  ;;  %v257_v18 = vshrl.u32 %v1014_v34, %v245_v58  ;;  %v259_v19 = vshll.u32 %v1014_v34, %v244_v50 }
  0x27   :  { %v249_v20 = vor.u32 %v248_v12, %v247_v62  ;;  %v252_v21 = vor.u32 %v251_v14, %v250_v13  ;;  %v260_v22 = vshrl.u32 %v1015_v41, %v245_v58  ;;  %vm262_vm6 = vcmp.lt.s32.totalorder %v243_v49, 1 }
  0x28   :  { %vm79_vm7 = vc.u32 %v1081_v9, %v1084_v10  ;;  %v80_v25 = vadd.s32 1, %v1085_v11  ;;  %v255_v27 = vor.u32 %v254_v16, %v253_v15  ;;  %v258_v31 = vor.u32 %v257_v18, %v256_v17 }
  0x29   :  { %v261_v33 = vor.u32 %v260_v22, %v259_v19  ;;  %vm263_vm8 = vcmp.lt.s32.totalorder %v243_v49, 2  ;;  %vm264_vm9 = vcmp.lt.s32.totalorder %v243_v49, 3  ;;  %vm265_vm10 = vcmp.lt.s32.totalorder %v243_v49, 4 }
  0x2a   :  { %v81_v35 = vsel %vm79_vm7, %v80_v25, %v1085_v11  ;;  %v266_v36 = vsel %vm262_vm6, %v246_v6, %v249_v20  ;;  %v270_v37 = vsel %vm262_vm6, %v249_v20, %v252_v21  ;;  %v267_v39 = vsel %vm265_vm10, %v255_v27, 2102212464 }
  0x2b   :  { %v82_v38 = vadd.s32 %v81_v35, %v77_v5  ;;  %v271_v40 = vsel %vm265_vm10, %v258_v31, 920167782  ;;  %v274_v42 = vsel %vm262_vm6, %v252_v21, %v255_v27  ;;  %v268_v43 = vsel %vm264_vm9, %v252_v21, %v267_v39 }
  0x2c   :  { %v272_v44 = vsel %vm264_vm9, %v255_v27, %v271_v40  ;;  %v275_v45 = vsel %vm265_vm10, %v261_v33, 1326507024  ;;  %vm449_vm11 = vcmp.gt.s32.totalorder %v448_v29, 0  ;;  %v438_v48 = vand.u32 2147483647, %v1040_v4 }
  0x2d   :  { %v83_v24 = vadd.s32 536870912, %v82_v38  ;;  %v273_v46 = vsel %vm263_vm8, %v270_v37, %v272_v44  ;;  %v276_v47 = vsel %vm264_vm9, %v258_v31, %v275_v45  ;;  %v269_v50 = vsel %vm263_vm8, %v266_v36, %v268_v43 }
  0x2e   :  { %v277_v51 = vsel %vm263_vm8, %v274_v42, %v276_v47  ;;  %v1110_v52 = vmul.u32.u64.low %v1051_v23, %v273_v46  ;;  %v1111_v53 = vmul.u32.u64.high %v1051_v23, %v273_v46, %v1110_v52  ;;  %v450_v57 = vsel %vm449_vm11, %v448_v29, 0 }
  0x2f   :  { %v84_v54 = vshrl.u32 %v83_v24, 30  ;;  %v1115_v55 = vmul.u32.u64.low %v1051_v23, %v277_v51  ;;  %v1116_v56 = vmul.u32.u64.high %v1051_v23, %v277_v51, %v1115_v55  ;;  %v452_v58 = vand.u32 31, %v450_v57 }
  0x30   :  { %v285_v60 = vmul.u32 %v1051_v23, %v269_v50  ;;  %v288_v61 = vadd.s32 1, %v1111_v53  ;;  %v445_v49 = vand.u32 8388607, %v438_v48  ;;  %v1125_v63 = vmul.f32 8.0, %v1032_v0 }
  0x31   :  { %v85_v59 = vshll.u32 %v84_v54, 30  ;;  %vm287_vm12 = vc.u32 %v1116_v56, %v1110_v52  ;;  %v453_v5 = vsub.s32 32, %v452_v58  ;;  %v455_v14 = vshll.u32 %v1010_v26, %v452_v58 }
  0x32   :  { %v289_v2 = vsel %vm287_vm12, %v288_v61, %v1111_v53  ;;  %v446_v11 = vor.u32 8388608, %v445_v49  ;;  %v649_v23 = vand.u32 2139095040, %v1125_v63  ;;  %v458_v16 = vshll.u32 %v1011_v28, %v452_v58 }
  0x33   :  { %v86_v62 = vsub.s32 %v82_v38, %v85_v59  ;;  %v290_v8 = vadd.s32 %v289_v2, %v285_v60  ;;  %v456_v15 = vshrl.u32 %v1011_v28, %v453_v5  ;;  %v459_v18 = vshrl.u32 %v1012_v30, %v453_v5 }
  0x34   :  { %v461_v19 = vshll.u32 %v1012_v30, %v452_v58  ;;  %v462_v20 = vshrl.u32 %v1013_v32, %v453_v5  ;;  %v1138_v22 = vshll.u32 %v446_v11, 8  ;;  %v646_v25 = vand.u32 2147483647, %v1125_v63 }
  0x35   :  { %v88_v6 = vsub.s32 0, %v86_v62  ;;  %v291_v13 = vadd.s32 536870912, %v290_v8  ;;  %v78_v27 = vadd.s32 %v1084_v10, %v1081_v9  ;;  %v464_v31 = vshll.u32 %v1013_v32, %v452_v58 }
  0x36   :  { %v465_v33 = vshrl.u32 %v1014_v34, %v453_v5  ;;  %v108_v35 = vsub.s32 4, %v84_v54  ;;  %v451_v37 = vshrl.u32 %v450_v57, 5  ;;  %v650_v38 = vshrl.u32 %v649_v23, 23 }
  0x37   :  { %v892_v12 = vmin.u32 %v88_v6, %v86_v62  ;;  %v1136_v21 = vshrl.u32 %v291_v13, 30  ;;  %v457_v40 = vor.u32 %v456_v15, %v455_v14  ;;  %v460_v42 = vor.u32 %v459_v18, %v458_v16 }
  0x38   :  { %v463_v9 = vor.u32 %v462_v20, %v461_v19  ;;  %v467_v44 = vshll.u32 %v1014_v34, %v452_v58  ;;  %v468_v45 = vshrl.u32 %v1015_v41, %v453_v5  ;;  %v466_v50 = vor.u32 %v465_v33, %v464_v31 }
  0x39   :  { %v90_v17 = vclz %v892_v12  ;;  %v293_v36 = vshll.u32 %v1136_v21, 30  ;;  %v454_v51 = vshrl.u32 %v1010_v26, %v453_v5  ;;  %vm470_vm0 = vcmp.lt.s32.totalorder %v451_v37, 1 }
  0x3a   :  { %vm473_vm1 = vcmp.lt.s32.totalorder %v451_v37, 4  ;;  %v109_v57 = vsel %vm24_vm13, %v108_v35, %v84_v54  ;;  %v469_v60 = vor.u32 %v468_v45, %v467_v44  ;;  %vm471_vm2 = vcmp.lt.s32.totalorder %v451_v37, 2 }
  0x3b   :  { %v893_v29 = vadd.s32 4294967294, %v90_v17  ;;  %v1152_v43 = vsub.s32 %v290_v8, %v293_v36  ;;  %v475_v59 = vsel %vm473_vm1, %v463_v9, 2102212464  ;;  %vm472_vm3 = vcmp.lt.s32.totalorder %v451_v37, 3 }
  0x3c   :  { %v479_v2 = vsel %vm473_vm1, %v466_v50, 920167782  ;;  %v286_v5 = vadd.s32 %v1110_v52, %v1116_v56  ;;  %v474_v8 = vsel %vm470_vm0, %v454_v51, %v457_v40  ;;  %v476_v54 = vsel %vm472_vm3, %v460_v42, %v475_v59 }
  0x3d   :  { %vm894_vm15 = vcmp.lt.s32.totalorder %v893_v29, 0  ;;  %v296_v1 = vsub.s32 0, %v1152_v43  ;;  %v480_v23 = vsel %vm472_vm3, %v463_v9, %v479_v2  ;;  %v482_v13 = vsel %vm470_vm0, %v460_v42, %v463_v9 }
  0x3e   :  { %v93_v10 = vsel %vm894_vm15, 0, %v893_v29  ;;  %v111_v14 = vsel %vm1148_vm14, 0, %v109_v57  ;;  %vm232_vm4 = vcmp.lt.s32.totalorder %v1037_v3, 0  ;;  %v483_v52 = vsel %vm473_vm1, %v469_v60, 1326507024 }
  0x3f   :  { %v94_v24 = vsub.s32 32, %v93_v10  ;;  %v95_v46 = vshll.u32 %v86_v62, %v93_v10  ;;  %v98_v47 = vsub.s32 4294967266, %v93_v10  ;;  %v900_v58 = vmin.u32 %v296_v1, %v1152_v43 }
  0x40   :  { %v478_v62 = vsel %vm470_vm0, %v457_v40, %v460_v42  ;;  %v484_v17 = vsel %vm472_vm3, %v466_v50, %v483_v52  ;;  %v477_v20 = vsel %vm471_vm2, %v474_v8, %v476_v54  ;;  %v915_v29 = vadd.s32 4294967169, %v650_v38 }
  0x41   :  { %v96_v53 = vshrl.u32 %v78_v27, %v94_v24  ;;  %v99_v55 = vadd.s32 127, %v98_v47  ;;  %v298_v6 = vclz %v900_v58  ;;  %v481_v16 = vsel %vm471_vm2, %v478_v62, %v480_v23 }
  0x42   :  { %v1177_v18 = vmul.u32.u64.low %v1138_v22, %v481_v16  ;;  %v1178_v19 = vmul.u32.u64.high %v1138_v22, %v481_v16, %v1177_v18  ;;  %v485_v27 = vsel %vm471_vm2, %v482_v13, %v484_v17  ;;  %vm1185_vm6 = vcmp.le.f32.partialorder %v230_v7, 0.7853982 }
  0x43   :  { %v97_v61 = vor.u32 %v96_v53, %v95_v46  ;;  %v100_v49 = vshll.u32 %v99_v55, 23  ;;  %v901_v15 = vadd.s32 4294967294, %v298_v6  ;;  %v656_v44 = vadd.s32 1, %v915_v29 }
  0x44   :  { %v1190_v36 = vmul.u32.u64.low %v1138_v22, %v485_v27  ;;  %v1191_v40 = vmul.u32.u64.high %v1138_v22, %v485_v27, %v1190_v36  ;;  %v316_v38 = vsub.s32 4, %v1136_v21  ;;  %v493_v45 = vmul.u32 %v1138_v22, %v477_v20 }
  0x45   :  { %v101_v11 = vor.u32 4788187, %v100_v49  ;;  %v104_v12 = vcvt.s32.f32 %v97_v61  ;;  %vm902_vm5 = vcmp.lt.s32.totalorder %v901_v15, 0  ;;  %v496_v7 = vadd.s32 1, %v1178_v19 }
  0x46   :  { %v301_v35 = vsel %vm902_vm5, 0, %v901_v15  ;;  %v1199_v47 = vand.u32 8388607, %v646_v25  ;;  %vm657_vm7 = vcmp.gt.s32.totalorder %v656_v44, 0  ;;  %vm495_vm8 = vc.u32 %v1191_v40, %v1177_v18 }
  0x47   :  { %v102_v56 = vand.u32 2147483647, %v101_v11  ;;  %v302_v42 = vsub.s32 32, %v301_v35  ;;  %v303_v9 = vshll.u32 %v1152_v43, %v301_v35  ;;  %v306_v10 = vsub.s32 4294967266, %v301_v35 }
  0x48   :  { %v115_v43 = vadd.s32 3, %v111_v14  ;;  %v658_v1 = vsel %vm657_vm7, %v656_v44, 0  ;;  %v497_v55 = vsel %vm495_vm8, %v496_v7, %v1178_v19  ;;  %v317_v57 = vsel %vm232_vm4, %v316_v38, %v1136_v21 }
  0x49   :  { %v105_v31 = vmul.f32 %v104_v12, %v102_v56  ;;  %v304_v24 = vshrl.u32 %v286_v5, %v302_v42  ;;  %v307_v46 = vadd.s32 127, %v306_v10  ;;  %v498_v59 = vadd.s32 %v497_v55, %v493_v45 }
  0x4a   :  { %v660_v58 = vand.u32 31, %v658_v1  ;;  %v654_v49 = vor.u32 8388608, %v1199_v47  ;;  %v1213_v62 = vand.u32 3, %v115_v43  ;;  %v1215_v39 = vand.u32 3, %v111_v14 }
  0x4b   :  { %v106_v37 = vxor.u32 2147483648, %v105_v31  ;;  %v305_v51 = vor.u32 %v304_v24, %v303_v9  ;;  %v308_v53 = vshll.u32 %v307_v46, 23  ;;  %v499_v2 = vadd.s32 536870912, %v498_v59 }
  0x4c   :  { %v661_v5 = vsub.s32 32, %v660_v58  ;;  %v319_v8 = vsel %vm1185_vm6, 0, %v317_v57  ;;  %v663_v54 = vshll.u32 %v1010_v26, %v660_v58  ;;  %v666_v21 = vshll.u32 %v1011_v28, %v660_v58 }
  0x4d   :  { %v107_v50 = vsel %vm24_vm13, %v106_v37, %v105_v31  ;;  %v309_v60 = vor.u32 4788187, %v308_v53  ;;  %v312_v61 = vcvt.s32.f32 %v305_v51  ;;  %v1221_v11 = vshrl.u32 %v499_v2, 30 }
  0x4e   :  { %v110_v22 = vsel %vm1148_vm14, %v1032_v0, %v107_v50  ;;  %v664_v12 = vshrl.u32 %v1011_v28, %v661_v5  ;;  %v669_v23 = vshll.u32 %v1012_v30, %v660_v58  ;;  %v672_v13 = vshll.u32 %v1013_v32, %v660_v58 }
  0x4f   :  { %949 = vcosq.f32 %v110_v22  ;;  %v310_v6 = vand.u32 2147483647, %v309_v60  ;;  %v667_v15 = vshrl.u32 %v1012_v30, %v661_v5  ;;  %v670_v16 = vshrl.u32 %v1013_v32, %v661_v5 }
  0x50   :  { %951 = vsinq.f32 %v110_v22  ;;  %v673_v52 = vshrl.u32 %v1014_v34, %v661_v5  ;;  %vm221_vm9 = vcmp.eq.s32.totalorder %v1215_v39, 0  ;;  %vm224_vm10 = vcmp.eq.s32.totalorder %v1215_v39, 2 }
  0x51   :  { %v313_v14 = vmul.f32 %v312_v61, %v310_v6  ;;  %v501_v56 = vshll.u32 %v1221_v11, 30  ;;  %v659_v17 = vshrl.u32 %v658_v1, 5  ;;  %vm117_vm11 = vcmp.lt.s32.totalorder %v1213_v62, 2 }
  0x52   :  { %vm118_vm12 = vcmp.eq.s32.totalorder %v1213_v62, 0  ;;  %vm121_vm13 = vcmp.eq.s32.totalorder %v1213_v62, 2  ;;  %vm220_vm14 = vcmp.lt.s32.totalorder %v1215_v39, 2  ;;  %v323_v30 = vadd.s32 3, %v319_v8 }
  0x53   :  { %v314_v28 = vxor.u32 2147483648, %v313_v14  ;;  %vm114_vm15 = vweird.f32 %v1032_v0  ;;  %v1237_v32 = vsub.s32 %v498_v59, %v501_v56  ;;  %v665_v19 = vor.u32 %v664_v12, %v663_v54 }
  0x54   :  { %v675_v20 = vshll.u32 %v1014_v34, %v660_v58  ;;  %v676_v27 = vshrl.u32 %v1015_v41, %v661_v5  ;;  %v668_v31 = vor.u32 %v667_v15, %v666_v21  ;;  %v671_v35 = vor.u32 %v670_v16, %v669_v23 }
  0x55   :  { %v315_v29 = vsel %vm232_vm4, %v314_v28, %v313_v14  ;;  %v674_v36 = vor.u32 %v673_v52, %v672_v13  ;;  %v504_v9 = vsub.s32 0, %v1237_v32  ;;  %vm678_vm0 = vcmp.lt.s32.totalorder %v659_v17, 1 }
  0x56   :  { %v318_v42 = vsel %vm1185_vm6, %v1037_v3, %v315_v29  ;;  %vm681_vm1 = vcmp.lt.s32.totalorder %v659_v17, 4  ;;  %v1247_v10 = vand.u32 3, %v323_v30  ;;  %v1249_v34 = vand.u32 3, %v319_v8 }
  0x57   :  { %953 = vcosq.f32 %v318_v42  ;;  %v662_v41 = vshrl.u32 %v1010_v26, %v661_v5  ;;  %v908_v44 = vmin.u32 %v504_v9, %v1237_v32  ;;  %vm680_vm2 = vcmp.lt.s32.totalorder %v659_v17, 3 }
  0x58   :  { %955 = vsinq.f32 %v318_v42  ;;  %v683_v37 = vsel %vm681_vm1, %v671_v35, 2102212464  ;;  %v677_v33 = vor.u32 %v676_v27, %v675_v20  ;;  %vm679_vm3 = vcmp.lt.s32.totalorder %v659_v17, 2 }
  0x59   :  { %v686_v45 = vsel %vm678_vm0, %v665_v19, %v668_v31  ;;  %v687_v7 = vsel %vm681_vm1, %v674_v36, 920167782  ;;  %vm865_vm4 = vcmask 1043456   ;;  %v494_v47 = vadd.s32 %v1177_v18, %v1191_v40 }
  0x5a   :  { %v506_v26 = vclz %v908_v44  ;;  %v694_v50 = vshll.u32 %v654_v49, 8  ;;  %v682_v1 = vsel %vm678_vm0, %v662_v41, %v665_v19  ;;  %v684_v22 = vsel %vm680_vm2, %v668_v31, %v683_v37 }
  0x5b   :  { %v688_v51 = vsel %vm680_vm2, %v671_v35, %v687_v7  ;;  %v690_v58 = vsel %vm678_vm0, %v668_v31, %v671_v35  ;;  %v691_v60 = vsel %vm681_vm1, %v677_v33, 1326507024  ;;  %v685_v8 = vsel %vm679_vm3, %v682_v1, %v684_v22 }
  0x5c   :  { %v950_v38 = vpop.eup %949  ;;  %v909_v57 = vadd.s32 4294967294, %v506_v26  ;;  %v689_v59 = vsel %vm679_vm3, %v686_v45, %v688_v51  ;;  %v692_v2 = vsel %vm680_vm2, %v674_v36, %v691_v60  ;;  %vm329_vm6 = vcmp.eq.s32.totalorder %v1247_v10, 2 }
  0x5d   :  { %v952_v24 = vpop.eup %951  ;;  %v122_v46 = vxor.u32 2147483648, %v950_v38  ;;  %v693_v54 = vsel %vm679_vm3, %v690_v58, %v692_v2  ;;  %v1287_v14 = vmul.u32.u64.low %v694_v50, %v689_v59  ;;  %v1288_v15 = vmul.u32.u64.high %v694_v50, %v689_v59, %v1287_v14 }
  0x5e   :  { %v119_v43 = vxor.u32 2147483648, %v952_v24  ;;  %vm910_vm5 = vcmp.lt.s32.totalorder %v909_v57, 0  ;;  %v1284_v39 = vmul.u32.u64.low %v694_v50, %v693_v54  ;;  %v1285_v13 = vmul.u32.u64.high %v694_v50, %v693_v54, %v1284_v39 }
  0x5f   :  { %v123_v53 = vsel %vm121_vm13, %v122_v46, %v952_v24  ;;  %v226_v55 = vsel %vm224_vm10, %v122_v46, %v952_v24  ;;  %v509_v6 = vsel %vm910_vm5, 0, %v909_v57  ;;  %vm428_vm7 = vcmp.lt.s32.totalorder %v1249_v34, 2 }
  0x60   :  { %v120_v18 = vsel %vm118_vm12, %v950_v38, %v119_v43  ;;  %v223_v40 = vsel %vm221_vm9, %v950_v38, %v119_v43  ;;  %v510_v12 = vsub.s32 32, %v509_v6  ;;  %v511_v62 = vshll.u32 %v1237_v32, %v509_v6 }
  0x61   :  { %v124_v61 = vsel %vm117_vm11, %v120_v18, %v123_v53  ;;  %v227_v49 = vsel %vm220_vm14, %v223_v40, %v226_v55  ;;  %v514_v23 = vsub.s32 4294967266, %v509_v6  ;;  %vm429_vm8 = vcmp.eq.s32.totalorder %v1249_v34, 0 }
  0x62   :  { %v228_v5 = vsel %vm114_vm15, nan, %v227_v49  ;;  %v125_v21 = vsel %vm114_vm15, nan, %v124_v61  ;;  %v512_v16 = vshrl.u32 %v494_v47, %v510_v12  ;;  %vm432_vm9 = vcmp.eq.s32.totalorder %v1249_v34, 2 }
  0x63   :  { %v515_v52 = vadd.s32 127, %v514_v23  ;;  %v854_v56 = vrot.slane %v228_v5, 4  ;;  %v701_v30 = vmul.u32 %v694_v50, %v685_v8  ;;  %vm326_vm10 = vcmp.eq.s32.totalorder %v1247_v10, 0 }
  0x64   :  { %v954_v0 = vpop.eup %953  ;;  %v513_v17 = vor.u32 %v512_v16, %v511_v62  ;;  %vm703_vm11 = vc.u32 %v1285_v13, %v1287_v14  ;;  %v704_v27 = vadd.s32 1, %v1288_v15  ;;  %vm325_vm12 = vcmp.lt.s32.totalorder %v1247_v10, 2 }
  0x65   :  { %v516_v28 = vshll.u32 %v515_v52, 23  ;;  %v866_v32 = vsel %vm865_vm4, %v125_v21, %v854_v56  ;;  %v956_v19 = vpop.eup %955  ;;  %v330_v20 = vxor.u32 2147483648, %v954_v0  ;;  %vm322_vm13 = vweird.f32 %v1037_v3 }
  0x66   :  { %870 = vst [vmem:[#allocation5] sm:$0xff] %v866_v32  ;;  %v327_v29 = vxor.u32 2147483648, %v956_v19  ;;  %v520_v35 = vcvt.s32.f32 %v513_v17  ;;  %v705_v9 = vsel %vm703_vm11, %v704_v27, %v1288_v15  ;;  %vm440_vm14 = vcmp.lt.s32.totalorder %v1040_v4, 0 }
  0x67   :  { %v517_v31 = vor.u32 4788187, %v516_v28  ;;  %v331_v36 = vsel %vm329_vm6, %v330_v20, %v956_v19  ;;  %v434_v42 = vsel %vm432_vm9, %v330_v20, %v956_v19  ;;  %v706_v38 = vadd.s32 %v705_v9, %v701_v30 }
  0x68   :  { %v328_v41 = vsel %vm326_vm10, %v954_v0, %v327_v29  ;;  %v431_v44 = vsel %vm429_vm8, %v954_v0, %v327_v29  ;;  %v524_v46 = vsub.s32 4, %v1221_v11  ;;  %vm439_vm15 = vcmp.le.f32.partialorder %v438_v48, 0.7853982 }
  0x69   :  { %v518_v37 = vand.u32 2147483647, %v517_v31  ;;  %v332_v33 = vsel %vm325_vm12, %v328_v41, %v331_v36  ;;  %v435_v45 = vsel %vm428_vm7, %v431_v44, %v434_v42  ;;  %v707_v10 = vadd.s32 536870912, %v706_v38 }
  0x6a   :  { %v333_v7 = vsel %vm322_vm13, nan, %v332_v33  ;;  %v436_v3 = vsel %vm322_vm13, nan, %v435_v45  ;;  %v525_v34 = vsel %vm440_vm14, %v524_v46, %v1221_v11  ;;  %v702_v61 = vadd.s32 %v1287_v14, %v1285_v13 }
  0x6b   :  { %v521_v24 = vmul.f32 %v520_v35, %v518_v37  ;;  %v857_v47 = vrot.slane %v436_v3, 4  ;;  %v708_v50 = vshrl.u32 %v707_v10, 30  ;;  %v527_v55 = vsel %vm439_vm15, 0, %v525_v34 }
  0x6c   :  { %v531_v18 = vadd.s32 3, %v527_v55  ;;  %v635_v60 = vand.u32 3, %v527_v55  ;;  %vm530_vm6 = vweird.f32 %v1040_v4  ;;  %vm648_vm9 = vcmp.lt.s32.totalorder %v1125_v63, 0 }
  0x6d   :  { %v522_v26 = vxor.u32 2147483648, %v521_v24  ;;  %v867_v43 = vsel %vm865_vm4, %v333_v7, %v857_v47  ;;  %v709_v22 = vshll.u32 %v708_v50, 30  ;;  %v732_v27 = vsub.s32 4, %v708_v50 }
  0x6e   :  { %871 = vst [vmem:[#allocation5 + $0x8] sm:$0xff] %v867_v43  ;;  %v532_v58 = vand.u32 3, %v531_v18  ;;  %vm637_vm2 = vcmp.eq.s32.totalorder %v635_v60, 0  ;;  %vm640_vm3 = vcmp.eq.s32.totalorder %v635_v60, 2  ;;  %vm636_vm8 = vcmp.lt.s32.totalorder %v635_v60, 2 }
  0x6f   :  { %v523_v1 = vsel %vm440_vm14, %v522_v26, %v521_v24  ;;  %v710_v53 = vsub.s32 %v706_v38, %v709_v22  ;;  %vm647_vm10 = vcmp.le.f32.partialorder %v646_v25, 0.7853982  ;;  %v733_v35 = vsel %vm648_vm9, %v732_v27, %v708_v50 }
  0x70   :  { %v526_v51 = vsel %vm439_vm15, %v1040_v4, %v523_v1  ;;  %vm537_vm1 = vcmp.eq.s32.totalorder %v532_v58, 2  ;;  %vm534_vm5 = vcmp.eq.s32.totalorder %v532_v58, 0  ;;  %vm533_vm7 = vcmp.lt.s32.totalorder %v532_v58, 2 }
  0x71   :  { %957 = vcosq.f32 %v526_v51  ;;  %v712_v57 = vsub.s32 0, %v710_v53  ;;  %v735_v42 = vsel %vm647_vm10, 0, %v733_v35 }
  0x72   :  { %959 = vsinq.f32 %v526_v51  ;;  %v739_v9 = vadd.s32 3, %v735_v42  ;;  %v843_v44 = vand.u32 3, %v735_v42 }
  0x73   :  { %v916_v59 = vmin.u32 %v712_v57, %v710_v53 }
  0x74   :  { %v740_v41 = vand.u32 3, %v739_v9  ;;  %vm848_vm12 = vcmp.eq.s32.totalorder %v843_v44, 2  ;;  %vm845_vm14 = vcmp.eq.s32.totalorder %v843_v44, 0 }
  0x75   :  { %v714_v40 = vclz %v916_v59 }
  0x76   :  { %vm745_vm11 = vcmp.eq.s32.totalorder %v740_v41, 2  ;;  %vm742_vm13 = vcmp.eq.s32.totalorder %v740_v41, 0  ;;  %vm741_vm15 = vcmp.lt.s32.totalorder %v740_v41, 2 }
  0x77   :  { %v917_v48 = vadd.s32 4294967294, %v714_v40 }
  0x79   :  { %vm918_vm0 = vcmp.lt.s32.totalorder %v917_v48, 0 }
  0x7a   :  { %v717_v49 = vsel %vm918_vm0, 0, %v917_v48  ;;  %vm844_vm0 = vcmp.lt.s32.totalorder %v843_v44, 2 }
  0x7b   :  { %v718_v2 = vsub.s32 32, %v717_v49  ;;  %v719_v5 = vshll.u32 %v710_v53, %v717_v49  ;;  %v722_v11 = vsub.s32 4294967266, %v717_v49 }
  0x7d   :  { %v720_v21 = vshrl.u32 %v702_v61, %v718_v2  ;;  %v723_v12 = vadd.s32 127, %v722_v11 }
  0x7e   :  { %v958_v6 = vpop.eup %957 }
  0x7f   :  { %v960_v8 = vpop.eup %959  ;;  %v538_v54 = vxor.u32 2147483648, %v958_v6  ;;  %v721_v13 = vor.u32 %v720_v21, %v719_v5  ;;  %v724_v14 = vshll.u32 %v723_v12, 23 }
  0x80   :  { %v535_v62 = vxor.u32 2147483648, %v960_v8 }
  0x81   :  { %v539_v23 = vsel %vm537_vm1, %v538_v54, %v960_v8  ;;  %v642_v39 = vsel %vm640_vm3, %v538_v54, %v960_v8  ;;  %v725_v0 = vor.u32 4788187, %v724_v14  ;;  %v728_v17 = vcvt.s32.f32 %v721_v13 }
  0x82   :  { %v536_v15 = vsel %vm534_vm5, %v958_v6, %v535_v62  ;;  %v639_v16 = vsel %vm637_vm2, %v958_v6, %v535_v62  ;;  %vm738_vm1 = vweird.f32 %v1125_v63 }
  0x83   :  { %v540_v52 = vsel %vm533_vm7, %v536_v15, %v539_v23  ;;  %v643_v56 = vsel %vm636_vm8, %v639_v16, %v642_v39  ;;  %v726_v32 = vand.u32 2147483647, %v725_v0 }
  0x84   :  { %v541_v28 = vsel %vm530_vm6, nan, %v540_v52  ;;  %v644_v30 = vsel %vm530_vm6, nan, %v643_v56 }
  0x85   :  { %v860_v19 = vrot.slane %v644_v30, 4  ;;  %v729_v20 = vmul.f32 %v728_v17, %v726_v32 }
  0x87   :  { %v868_v4 = vsel %vm865_vm4, %v541_v28, %v860_v19  ;;  %v730_v29 = vxor.u32 2147483648, %v729_v20 }
  0x88   :  { %872 = vst [vmem:[#allocation5 + $0x10] sm:$0xff] %v868_v4 }
  0x89   :  { %v731_v31 = vsel %vm648_vm9, %v730_v29, %v729_v20 }
  0x8a   :  { %v734_v36 = vsel %vm647_vm10, %v1125_v63, %v731_v31 }
  0x8b   :  { %961 = vcosq.f32 %v734_v36 }
  0x8c   :  { %963 = vsinq.f32 %v734_v36 }
  0x98   :  { %v962_v37 = vpop.eup %961 }
  0x99   :  { %v964_v38 = vpop.eup %963  ;;  %v746_v33 = vxor.u32 2147483648, %v962_v37 }
  0x9a   :  { %v743_v25 = vxor.u32 2147483648, %v964_v38 }
  0x9b   :  { %v747_v45 = vsel %vm745_vm11, %v746_v33, %v964_v38  ;;  %v850_v7 = vsel %vm848_vm12, %v746_v33, %v964_v38 }
  0x9c   :  { %v744_v3 = vsel %vm742_vm13, %v962_v37, %v743_v25  ;;  %v847_v24 = vsel %vm845_vm14, %v962_v37, %v743_v25 }
  0x9d   :  { %v748_v10 = vsel %vm741_vm15, %v744_v3, %v747_v45  ;;  %v851_v46 = vsel %vm844_vm0, %v847_v24, %v850_v7 }
  0x9e   :  { %v749_v47 = vsel %vm738_vm1, nan, %v748_v10  ;;  %v852_v26 = vsel %vm738_vm1, nan, %v851_v46 }
  0x9f   :  { %v863_v50 = vrot.slane %v852_v26, 4 }
  0xa1   :  { %v869_v43 = vsel %vm865_vm4, %v749_v47, %v863_v50 }
  0xa2   :  { %873 = vst [vmem:[#allocation5 + $0x18] sm:$0xff] %v869_v43 }
  0xa3   :  { %996 = shalt.err (!%p993_p9)
}
  0xa4   :  { %s1017_s13 = smov 128   ;;  %s1018_s14 = smov 8  }
  0xa5   :  { %885 = dma.vmem_to_hbm [thread:$0]  %s880_s11, 512, %s1330_s1, [#allocation4], %s1017_s13, %s1017_s13, %s1018_s14  }
  0xa6   :  { %1007 = dma.done.wait [#allocation4], 512  }
  0xa7   :  { %1008 = vsyncadd [#allocation4], 4294966784 }
  0xa8   :  { %889 = vsyncpa [#allocation3], 1 }
  0xa9   :  { %890 = vsyncpa [#allocation4], 1 }

</bundles_post_ra>
